<compile_context>
chip_gen: v6e
topology: v6e:2x2x1
jax: 0.10.0
libtpu: 0.0.40
codegen_flags: <defaults>
</compile_context>

<pallas_src>
import jax
import jax.numpy as jnp
from jax.experimental import pallas as pl
from jax.experimental.pallas import tpu as pltpu


def _event_encoder_kernel(state_ref, time_ref,
                          ws_ref, bs_ref,
                          wt_ref, bt_ref,
                          w1_ref, b1_ref,
                          w2_ref, b2_ref,
                          out_ref):
    x = state_ref[...]                       # (2,  TB)  batch on lanes
    t = time_ref[...]                        # (1,  TB)
    ws = ws_ref[...]                         # (H,  2)

    # Spatial branch Linear(2 -> H) + ReLU as two VPU broadcast-FMAs (no MXU).
    emb_state = jnp.maximum(
        ws[:, 0:1] * x[0:1, :] + ws[:, 1:2] * x[1:2, :] + bs_ref[...], 0.0)   # (H, TB)

    # Temporal branch Linear(1 -> H) + ReLU as a single VPU broadcast-FMA.
    emb_time = jnp.maximum(wt_ref[...] * t + bt_ref[...], 0.0)                # (H, TB)

    # Encoder layer 1: single merged K=2H MXU contraction on the sublane-concat.
    cat = jnp.concatenate([emb_time, emb_state], axis=0)                      # (2H, TB)
    h = jnp.dot(w1_ref[...], cat, preferred_element_type=jnp.float32) + b1_ref[...]
    h = jnp.maximum(h, 0.0)                                                   # (H, TB)

    # Encoder layer 2: Linear(H -> head_dim), no activation.
    out = jnp.dot(w2_ref[...], h, preferred_element_type=jnp.float32) + b2_ref[...]
    out_ref[...] = out.astype(out_ref.dtype)                                  # (hd, TB)


def event_encoder(state, time, params, *, tile_b=1024):
    """state: (N, 2) f32, time: (N, 1) f32 -> (N, head_dim) f32."""
    N = state.shape[0]
    ws, bs, wt, bt, w1, b1, w2, b2 = params
    H = ws.shape[0]
    head_dim = w2.shape[0]

    # Batch tile: multiple of 128 (lane-dense), clamped so tiny inputs don't over-pad.
    tile_b = min(tile_b, max(128, ((N + 127) // 128) * 128))
    n_pad = pl.cdiv(N, tile_b) * tile_b

    # Wrapper-side transpose + zero-pad to the lane-dense feature-major layout.
    state_t = jnp.zeros((2, n_pad), state.dtype).at[:, :N].set(state.T)
    time_t = jnp.zeros((1, n_pad), time.dtype).at[:, :N].set(time.T)

    full = lambda shape: pl.BlockSpec(shape, lambda i: (0, 0))

    out_t = pl.pallas_call(
        _event_encoder_kernel,
        out_shape=jax.ShapeDtypeStruct((head_dim, n_pad), jnp.float32),
        grid_spec=pltpu.PrefetchScalarGridSpec(
            num_scalar_prefetch=0,
            grid=(n_pad // tile_b,),
            in_specs=[
                pl.BlockSpec((2, tile_b), lambda i: (0, i)),   # state^T
                pl.BlockSpec((1, tile_b), lambda i: (0, i)),   # time^T
                full((H, 2)), full((H, 1)),                    # Ws, bs
                full((H, 1)), full((H, 1)),                    # Wt, bt
                full((H, 2 * H)), full((H, 1)),                # W1, b1
                full((head_dim, H)), full((head_dim, 1)),      # W2, b2
            ],
            out_specs=pl.BlockSpec((head_dim, tile_b), lambda i: (0, i)),
        ),
        compiler_params=pltpu.CompilerParams(
            dimension_semantics=("parallel",)),                # megacore-shardable
    )(state_t, time_t, ws, bs, wt, bt, w1, b1, w2, b2)

    return out_t[:, :N].T


def init_params(key, hidden_dim, head_dim):
    """Deterministic synthetic params, PyTorch-Linear-style uniform init.

    Weights are in PyTorch orientation (out_features, in_features); biases are
    (out_features, 1) columns for the feature-major kernel layout."""
    ks = jax.random.split(key, 8)

    def linear(kw, kb, fan_in, fan_out):
        bound = 1.0 / jnp.sqrt(fan_in)
        w = jax.random.uniform(kw, (fan_out, fan_in), jnp.float32, -bound, bound)
        b = jax.random.uniform(kb, (fan_out, 1), jnp.float32, -bound, bound)
        return w, b

    ws, bs = linear(ks[0], ks[1], 2, hidden_dim)                 # spatial
    wt, bt = linear(ks[2], ks[3], 1, hidden_dim)                 # temporal
    w1, b1 = linear(ks[4], ks[5], 2 * hidden_dim, hidden_dim)    # encoder[0]
    w2, b2 = linear(ks[6], ks[7], hidden_dim, head_dim)          # encoder[2]
    return (ws, bs, wt, bt, w1, b1, w2, b2)


def event_encoder_ref(state, time, params):
    """Pure-JAX reference in the original batch-major layout."""
    ws, bs, wt, bt, w1, b1, w2, b2 = params
    emb_state = jnp.maximum(state @ ws.T + bs.T, 0.0)
    emb_time = jnp.maximum(time @ wt.T + bt.T, 0.0)
    cat = jnp.concatenate([emb_time, emb_state], axis=-1)
    h = jnp.maximum(cat @ w1.T + b1.T, 0.0)
    return h @ w2.T + b2.T


if __name__ == "__main__":
    hidden_dim = 32
    head_dim = 16
    N = 16                          # small, non-multiple-of-128 batch exercises padding

    key = jax.random.PRNGKey(0)
    k_state, k_time, k_params = jax.random.split(key, 3)

    state = jax.random.normal(k_state, (N, 2), jnp.float32)   # (x, y) locations
    time = jax.random.normal(k_time, (N, 1), jnp.float32)     # scalar times
    params = init_params(k_params, hidden_dim, head_dim)

    out = event_encoder(state, time, params)
    out = jax.block_until_ready(out)

    ref = event_encoder_ref(state, time, params)
    assert out.shape == (N, head_dim)
    assert jnp.allclose(out, ref, atol=1e-5, rtol=1e-5), "mismatch vs JAX reference"

    print("KERNEL_OK")
</pallas_src>

<mosaic_0001>
module attributes {stable_mosaic.version = 11 : i64} {
  func.func @_event_encoder_kernel(%arg0: i32, %arg1: memref<2x128xf32, #tpu.memory_space<vmem>>, %arg2: memref<1x128xf32, #tpu.memory_space<vmem>>, %arg3: memref<32x2xf32, #tpu.memory_space<vmem>>, %arg4: memref<32x1xf32, #tpu.memory_space<vmem>>, %arg5: memref<32x1xf32, #tpu.memory_space<vmem>>, %arg6: memref<32x1xf32, #tpu.memory_space<vmem>>, %arg7: memref<32x64xf32, #tpu.memory_space<vmem>>, %arg8: memref<32x1xf32, #tpu.memory_space<vmem>>, %arg9: memref<16x32xf32, #tpu.memory_space<vmem>>, %arg10: memref<16x1xf32, #tpu.memory_space<vmem>>, %arg11: memref<16x128xf32, #tpu.memory_space<vmem>>) attributes {dimension_semantics = [#tpu.dimension_semantics<parallel>], iteration_bounds = array<i64: 1>, scalar_prefetch = 0 : i64, scratch_operands = 0 : i64, tpu.core_type = #tpu.core_type<tc>, window_params = [{transform_indices = @transform_0, window_bounds = array<i64: 2, 128>}, {transform_indices = @transform_1, window_bounds = array<i64: 1, 128>}, {pipeline_mode = #tpu.pipeline_mode<synchronous>, transform_indices = @transform_2, window_bounds = array<i64: 32, 2>}, {pipeline_mode = #tpu.pipeline_mode<synchronous>, transform_indices = @transform_3, window_bounds = array<i64: 32, 1>}, {pipeline_mode = #tpu.pipeline_mode<synchronous>, transform_indices = @transform_4, window_bounds = array<i64: 32, 1>}, {pipeline_mode = #tpu.pipeline_mode<synchronous>, transform_indices = @transform_5, window_bounds = array<i64: 32, 1>}, {pipeline_mode = #tpu.pipeline_mode<synchronous>, transform_indices = @transform_6, window_bounds = array<i64: 32, 64>}, {pipeline_mode = #tpu.pipeline_mode<synchronous>, transform_indices = @transform_7, window_bounds = array<i64: 32, 1>}, {pipeline_mode = #tpu.pipeline_mode<synchronous>, transform_indices = @transform_8, window_bounds = array<i64: 16, 32>}, {pipeline_mode = #tpu.pipeline_mode<synchronous>, transform_indices = @transform_9, window_bounds = array<i64: 16, 1>}, {transform_indices = @transform_10, window_bounds = array<i64: 16, 128>}]} {
    %c0 = arith.constant 0 : index
    %c0_0 = arith.constant 0 : index
    %0 = vector.load %arg1[%c0, %c0_0] : memref<2x128xf32, #tpu.memory_space<vmem>>, vector<2x128xf32>
    %c0_1 = arith.constant 0 : index
    %c0_2 = arith.constant 0 : index
    %1 = vector.load %arg2[%c0_1, %c0_2] : memref<1x128xf32, #tpu.memory_space<vmem>>, vector<1x128xf32>
    %c0_3 = arith.constant 0 : index
    %c0_4 = arith.constant 0 : index
    %2 = vector.load %arg3[%c0_3, %c0_4] : memref<32x2xf32, #tpu.memory_space<vmem>>, vector<32x2xf32>
    %3 = vector.extract_strided_slice %2 {offsets = [0, 0], sizes = [32, 1], strides = [1, 1]} : vector<32x2xf32> to vector<32x1xf32>
    %4 = vector.extract_strided_slice %0 {offsets = [0, 0], sizes = [1, 128], strides = [1, 1]} : vector<2x128xf32> to vector<1x128xf32>
    %5 = vector.broadcast %3 : vector<32x1xf32> to vector<32x128xf32>
    %6 = vector.broadcast %4 : vector<1x128xf32> to vector<32x128xf32>
    %7 = arith.mulf %5, %6 : vector<32x128xf32>
    %8 = vector.extract_strided_slice %2 {offsets = [0, 1], sizes = [32, 1], strides = [1, 1]} : vector<32x2xf32> to vector<32x1xf32>
    %9 = vector.extract_strided_slice %0 {offsets = [1, 0], sizes = [1, 128], strides = [1, 1]} : vector<2x128xf32> to vector<1x128xf32>
    %10 = vector.broadcast %8 : vector<32x1xf32> to vector<32x128xf32>
    %11 = vector.broadcast %9 : vector<1x128xf32> to vector<32x128xf32>
    %12 = arith.mulf %10, %11 : vector<32x128xf32>
    %13 = arith.addf %7, %12 : vector<32x128xf32>
    %c0_5 = arith.constant 0 : index
    %c0_6 = arith.constant 0 : index
    %14 = vector.load %arg4[%c0_5, %c0_6] : memref<32x1xf32, #tpu.memory_space<vmem>>, vector<32x1xf32>
    %15 = vector.broadcast %14 : vector<32x1xf32> to vector<32x128xf32>
    %16 = arith.addf %13, %15 : vector<32x128xf32>
    %cst = arith.constant 0.000000e+00 : f32
    %17 = vector.broadcast %cst : f32 to vector<32x128xf32>
    %18 = arith.maximumf %16, %17 : vector<32x128xf32>
    %c0_7 = arith.constant 0 : index
    %c0_8 = arith.constant 0 : index
    %19 = vector.load %arg5[%c0_7, %c0_8] : memref<32x1xf32, #tpu.memory_space<vmem>>, vector<32x1xf32>
    %20 = vector.broadcast %19 : vector<32x1xf32> to vector<32x128xf32>
    %21 = vector.broadcast %1 : vector<1x128xf32> to vector<32x128xf32>
    %22 = arith.mulf %20, %21 : vector<32x128xf32>
    %c0_9 = arith.constant 0 : index
    %c0_10 = arith.constant 0 : index
    %23 = vector.load %arg6[%c0_9, %c0_10] : memref<32x1xf32, #tpu.memory_space<vmem>>, vector<32x1xf32>
    %24 = vector.broadcast %23 : vector<32x1xf32> to vector<32x128xf32>
    %25 = arith.addf %22, %24 : vector<32x128xf32>
    %cst_11 = arith.constant 0.000000e+00 : f32
    %26 = vector.broadcast %cst_11 : f32 to vector<32x128xf32>
    %27 = arith.maximumf %25, %26 : vector<32x128xf32>
    %28 = tpu.concatenate %27, %18 in 0 : vector<32x128xf32>, vector<32x128xf32> -> vector<64x128xf32>
    %c0_12 = arith.constant 0 : index
    %c0_13 = arith.constant 0 : index
    %29 = vector.load %arg7[%c0_12, %c0_13] : memref<32x64xf32, #tpu.memory_space<vmem>>, vector<32x64xf32>
    %cst_14 = arith.constant dense<0.000000e+00> : vector<32x128xf32>
    %30 = tpu.matmul %29, %28, %cst_14 {dimension_numbers = #tpu.dot_dimension_numbers<[1], [0], [0], [1], [0, 0, 1, 1], [], []>} : vector<32x64xf32>, vector<64x128xf32>, vector<32x128xf32> -> vector<32x128xf32>
    %c0_15 = arith.constant 0 : index
    %c0_16 = arith.constant 0 : index
    %31 = vector.load %arg8[%c0_15, %c0_16] : memref<32x1xf32, #tpu.memory_space<vmem>>, vector<32x1xf32>
    %32 = vector.broadcast %31 : vector<32x1xf32> to vector<32x128xf32>
    %33 = arith.addf %30, %32 : vector<32x128xf32>
    %cst_17 = arith.constant 0.000000e+00 : f32
    %34 = vector.broadcast %cst_17 : f32 to vector<32x128xf32>
    %35 = arith.maximumf %33, %34 : vector<32x128xf32>
    %c0_18 = arith.constant 0 : index
    %c0_19 = arith.constant 0 : index
    %36 = vector.load %arg9[%c0_18, %c0_19] : memref<16x32xf32, #tpu.memory_space<vmem>>, vector<16x32xf32>
    %cst_20 = arith.constant dense<0.000000e+00> : vector<16x128xf32>
    %37 = tpu.matmul %36, %35, %cst_20 {dimension_numbers = #tpu.dot_dimension_numbers<[1], [0], [0], [1], [0, 0, 1, 1], [], []>} : vector<16x32xf32>, vector<32x128xf32>, vector<16x128xf32> -> vector<16x128xf32>
    %c0_21 = arith.constant 0 : index
    %c0_22 = arith.constant 0 : index
    %38 = vector.load %arg10[%c0_21, %c0_22] : memref<16x1xf32, #tpu.memory_space<vmem>>, vector<16x1xf32>
    %39 = vector.broadcast %38 : vector<16x1xf32> to vector<16x128xf32>
    %40 = arith.addf %37, %39 : vector<16x128xf32>
    %c0_23 = arith.constant 0 : index
    %c0_24 = arith.constant 0 : index
    %41 = vector.load %arg11[%c0_23, %c0_24] : memref<16x128xf32, #tpu.memory_space<vmem>>, vector<16x128xf32>
    tpu.vector_store %arg11[%c0_23, %c0_24], %40 {strides = array<i32>} : memref<16x128xf32, #tpu.memory_space<vmem>>, vector<16x128xf32>,
    return
  }
  func.func @transform_0(%arg0: i32) -> (i32, i32) {
    %c0_i32 = arith.constant 0 : i32
    %c0_i32_0 = arith.constant 0 : i32
    return %c0_i32, %arg0 : i32, i32
  }
  func.func @transform_1(%arg0: i32) -> (i32, i32) {
    %c0_i32 = arith.constant 0 : i32
    %c0_i32_0 = arith.constant 0 : i32
    return %c0_i32, %arg0 : i32, i32
  }
  func.func @transform_2(%arg0: i32) -> (i32, i32) {
    %c0_i32 = arith.constant 0 : i32
    %c0_i32_0 = arith.constant 0 : i32
    %c0_i32_1 = arith.constant 0 : i32
    return %c0_i32, %c0_i32_0 : i32, i32
  }
  func.func @transform_3(%arg0: i32) -> (i32, i32) {
    %c0_i32 = arith.constant 0 : i32
    %c0_i32_0 = arith.constant 0 : i32
    %c0_i32_1 = arith.constant 0 : i32
    return %c0_i32, %c0_i32_0 : i32, i32
  }
  func.func @transform_4(%arg0: i32) -> (i32, i32) {
    %c0_i32 = arith.constant 0 : i32
    %c0_i32_0 = arith.constant 0 : i32
    %c0_i32_1 = arith.constant 0 : i32
    return %c0_i32, %c0_i32_0 : i32, i32
  }
  func.func @transform_5(%arg0: i32) -> (i32, i32) {
    %c0_i32 = arith.constant 0 : i32
    %c0_i32_0 = arith.constant 0 : i32
    %c0_i32_1 = arith.constant 0 : i32
    return %c0_i32, %c0_i32_0 : i32, i32
  }
  func.func @transform_6(%arg0: i32) -> (i32, i32) {
    %c0_i32 = arith.constant 0 : i32
    %c0_i32_0 = arith.constant 0 : i32
    %c0_i32_1 = arith.constant 0 : i32
    return %c0_i32, %c0_i32_0 : i32, i32
  }
  func.func @transform_7(%arg0: i32) -> (i32, i32) {
    %c0_i32 = arith.constant 0 : i32
    %c0_i32_0 = arith.constant 0 : i32
    %c0_i32_1 = arith.constant 0 : i32
    return %c0_i32, %c0_i32_0 : i32, i32
  }
  func.func @transform_8(%arg0: i32) -> (i32, i32) {
    %c0_i32 = arith.constant 0 : i32
    %c0_i32_0 = arith.constant 0 : i32
    %c0_i32_1 = arith.constant 0 : i32
    return %c0_i32, %c0_i32_0 : i32, i32
  }
  func.func @transform_9(%arg0: i32) -> (i32, i32) {
    %c0_i32 = arith.constant 0 : i32
    %c0_i32_0 = arith.constant 0 : i32
    %c0_i32_1 = arith.constant 0 : i32
    return %c0_i32, %c0_i32_0 : i32, i32
  }
  func.func @transform_10(%arg0: i32) -> (i32, i32) {
    %c0_i32 = arith.constant 0 : i32
    %c0_i32_0 = arith.constant 0 : i32
    return %c0_i32, %arg0 : i32, i32
  }
}

</mosaic_0001>

<bundles_post_ra>
// kernel: tpu_custom_call.1
= control target key start
LH: loop header
LB: loop body
LE: loop exit
PB: predicated region body
PF: predicated region fallthrough
CT: control target
= control target key end

     0   :  { %v532_v2 = vmov 1   ;;  %v533_v3 = vmov 0   ;;  %s691_s0 = inlined_call_operand.vmem [shape: f32[2,128], index: 0, kind: input, shape index: {}]   ;;  %s692_s1 = inlined_call_operand.vmem [shape: f32[1,128], index: 1, kind: input, shape index: {}]   ;;  %s693_s2 = inlined_call_operand.vmem [shape: f32[32,2], index: 2, kind: input, shape index: {}]   ;;  %s694_s3 = inlined_call_operand.vmem [shape: f32[32,1], index: 3, kind: input, shape index: {}]   ;;  %s695_s4 = inlined_call_operand.vmem [shape: f32[32,1], index: 4, kind: input, shape index: {}]   ;;  %s696_s5 = inlined_call_operand.vmem [shape: f32[32,1], index: 5, kind: input, shape index: {}]   ;;  %s697_s6 = inlined_call_operand.vmem [shape: f32[32,64], index: 6, kind: input, shape index: {}]   ;;  %s698_s7 = inlined_call_operand.vmem [shape: f32[32,1], index: 7, kind: input, shape index: {}]   ;;  %s699_s8 = inlined_call_operand.vmem [shape: f32[16,32], index: 8, kind: input, shape index: {}]   ;;  %s700_s9 = inlined_call_operand.vmem [shape: f32[16,1], index: 9, kind: input, shape index: {}]   ;;  %s701_s10 = inlined_call_operand.hbm [shape: f32[16,128], index: 10, kind: output, shape index: {}]  }
   0x1   :  { %v41_v0 = vld [vmem:[%s693_s2 + $0x18] sm:$0xff]  ;;  %v40_v1 = vld [vmem:[%s693_s2 + $0x10] sm:$0xff]  ;;  %503 = vset.pattern.permute.xlu0 %v532_v2  ;;  %504 = vset.pattern.permute.xlu1 %v533_v3  ;;  %v39_v4 = vld [vmem:[%s693_s2 + $0x8] sm:$0xff] }
   0x2   :  { %83 = vperm.xlu0 %503, %v41_v0   ;;  %54 = vperm.xlu1 %504, %v40_v1  }
   0x6   :  { %505 = vset.pattern.permute.xlu1 %v532_v2  ;;  %75 = vperm.xlu0 %503, %v39_v4  }
   0x7   :  { %79 = vperm.xlu1 %505, %v40_v1  }
   0x8   :  { %15 = vsyncpa [#allocation3], 0  ;;  %v38_v5 = vld [vmem:[%s693_s2] sm:$0xff]  ;;  %v101_v6 = vld [vmem:[%s694_s3 + $0x18] sm:$0xff]  ;;  %vm224_vm0 = vcmask 523264   ;;  %v62_v25 = vlaneseq  ;;  %vm340_vm1 = vcmask 261120  }
   0x9   :  { %v99_v7 = vld [vmem:[%s694_s3 + $0x8] sm:$0xff]  ;;  %v133_v8 = vld [vmem:[%s695_s4 + $0x18] sm:$0xff]  ;;  %v100_v9 = vld [vmem:[%s694_s3 + $0x10] sm:$0xff]  ;;  %s534_s22 = smov [#allocation2]  }
   0xa   :  { %507 = vset.pattern.permute.xlu0 %v533_v3  ;;  %v167_v10 = vld [vmem:[%s696_s5 + $0x18] sm:$0xff]  ;;  %v98_v11 = vld [vmem:[%s694_s3] sm:$0xff]  ;;  %v166_v12 = vld [vmem:[%s696_s5 + $0x10] sm:$0xff]  ;;  %v63_v26 = vshrl.u32 %v62_v25, 7  ;;  %s429_s23 = sshll.u32 %s534_s22, 4  ;;  %s430_s23 = int_to_ptr.vmem [resolvable:$true] %s429_s23 }
   0xb   :  { %506 = vset.pattern.permute.xlu1 %v533_v3  ;;  %59 = vperm.xlu0 %507, %v41_v0   ;;  %v132_v13 = vld [vmem:[%s695_s4 + $0x10] sm:$0xff]  ;;  %v165_v14 = vld [vmem:[%s696_s5 + $0x8] sm:$0xff]  ;;  %v203_v16 = vld [vmem:[%s698_s7 + $0x18] sm:$0xff]  ;;  %s510_s24 = scalar_lea.vmem %s430_s23, 256  ;;  %p515_p1 = scmp.lt.s32.totalorder %s430_s23, %s430_s23 }
   0xc   :  { %49 = vperm.xlu1 %506, %v39_v4   ;;  %v131_v15 = vld [vmem:[%s695_s4 + $0x8] sm:$0xff]  ;;  %v130_v17 = vld [vmem:[%s695_s4] sm:$0xff]  ;;  %v202_v22 = vld [vmem:[%s698_s7 + $0x10] sm:$0xff]  ;;  %v88_v29 = vsub.s32 1, %v63_v26  ;;  %v64_v30 = vsub.s32 0, %v63_v26  ;;  %p511_p0 = scmp.ne.s32.totalorder %s430_s23, %s510_s24  ;;  %p516_p2 = scmp.lt.s32.totalorder %s510_s24, %s510_s24 }
   0xd   :  { %v201_v18 = vld [vmem:[%s698_s7 + $0x8] sm:$0xff]  ;;  %v164_v19 = vld [vmem:[%s696_s5] sm:$0xff] }
   0xe   :  { %v328_v20 = vld [vmem:[%s700_s9] sm:$0xff]  ;;  %v329_v24 = vld [vmem:[%s700_s9 + $0x8] sm:$0xff]  ;;  %p517_p3 = por %p516_p2, %p515_p1 }
   0xf   :  { %44 = vperm.xlu0 %507, %v38_v5   ;;  %v196_v21 = vld [vmem:[%s697_s6] sm:$0xff] }
  0x10   :  { %119 = vperm.xlu1 %506, %v101_v6   ;;  %481 = vmatprep.mubr.msk.f32.mxu0 %vm224_vm0, %v196_v21  ;;  %v200_v23 = vld [vmem:[%s698_s7] sm:$0xff]  ;;  %v197_v21 = vld [vmem:[%s697_s6 + $0x8] sm:$0xff]  ;;  %p518_p4 = pnand %p517_p3, %p511_p0 }
  0x11   :  { %v36_v32 = vld [vmem:[%s691_s0] sm:$0x3] }
  0x12   :  { %v89_v34 = vrot.slane %v36_v32, %v88_v29  ;;  %v65_v35 = vrot.slane %v36_v32, %v64_v30  ;;  %v440_v56 = vld [vmem:[%s692_s1] ss:$0 sm:$0xff] }
  0x13   :  { %109 = vperm.xlu0 %507, %v99_v7  }
  0x14   :  { %508 = vset.pattern.permute.xlu1 %v532_v2 }
  0x15   :  { %71 = vperm.xlu1 %508, %v38_v5  }
  0x17   :  { %151 = vperm.xlu0 %507, %v133_v8  }
  0x19   :  { %509 = vset.pattern.permute.xlu1 %v533_v3 }
  0x1a   :  { %114 = vperm.xlu1 %509, %v100_v9  }
  0x1b   :  { %185 = vperm.xlu0 %507, %v167_v10  }
  0x1e   :  { %104 = vperm.xlu1 %509, %v98_v11  }
  0x1f   :  { %180 = vperm.xlu0 %507, %v166_v12  }
  0x22   :  { %146 = vperm.xlu1 %509, %v132_v13  }
  0x23   :  { %175 = vperm.xlu0 %507, %v165_v14  }
  0x26   :  { %141 = vperm.xlu1 %509, %v131_v15  }
  0x27   :  { %221 = vperm.xlu0 %507, %v203_v16  }
  0x2a   :  { %136 = vperm.xlu1 %509, %v130_v17  }
  0x2b   :  { %211 = vperm.xlu0 %507, %v201_v18  }
  0x2e   :  { %170 = vperm.xlu1 %509, %v164_v19  }
  0x2f   :  { %332 = vperm.xlu0 %507, %v328_v20  }
  0x32   :  { %216 = vperm.xlu1 %509, %v202_v22   ;;  %v198_v22 = vld [vmem:[%s697_s6 + $0x10] sm:$0xff] }
  0x36   :  { %206 = vperm.xlu1 %509, %v200_v23   ;;  %v199_v23 = vld [vmem:[%s697_s6 + $0x18] sm:$0xff] }
  0x3a   :  { %337 = vperm.xlu1 %509, %v329_v24   ;;  %v326_v24 = vld [vmem:[%s699_s8] sm:$0xff] }
  0x3b   :  { %495 = vmatprep.mubr.msk.f32.mxu1 %vm340_vm1, %v326_v24 }
  0x7d   :  { %v55_v27 = vpop.permute.xlu1 %54  ;;  %v84_v28 = vpop.permute.xlu0 %83 }
  0x7e   :  { %v93_v36 = vmul.f32 %v89_v34, %v84_v28  ;;  %v68_v50 = vmul.f32 %v65_v35, %v55_v27 }
  0x81   :  { %v76_v31 = vpop.permute.xlu0 %75 }
  0x82   :  { %v80_v33 = vpop.permute.xlu1 %79  ;;  %v91_v47 = vmul.f32 %v89_v34, %v76_v31 }
  0x83   :  { %v92_v46 = vmul.f32 %v89_v34, %v80_v33 }
  0x85   :  { %v96_v55 = vadd.f32 %v92_v46, %v68_v50 }
  0x86   :  { %v60_v37 = vpop.permute.xlu0 %59 }
  0x87   :  { %v69_v38 = vmul.f32 %v65_v35, %v60_v37  ;;  %v50_v39 = vpop.permute.xlu1 %49 }
  0x88   :  { %v67_v48 = vmul.f32 %v65_v35, %v50_v39 }
  0x89   :  { %v97_v40 = vadd.f32 %v93_v36, %v69_v38 }
  0x8a   :  { %v45_v41 = vpop.permute.xlu0 %44  ;;  %v95_v53 = vadd.f32 %v91_v47, %v67_v48 }
  0x8b   :  { %v120_v42 = vpop.permute.xlu1 %119  ;;  %v66_v52 = vmul.f32 %v65_v35, %v45_v41  ;;  %v327_v41 = vld [vmem:[%s699_s8 + $0x8] sm:$0xff] }
  0x8c   :  { %v125_v43 = vadd.f32 %v120_v42, %v97_v40 }
  0x8e   :  { %v129_v44 = vmax.f32 %v125_v43, 0.0  ;;  %v110_v45 = vpop.permute.xlu0 %109 }
  0x8f   :  { %v123_v58 = vadd.f32 %v110_v45, %v95_v53 }
  0x90   :  { %v72_v49 = vpop.permute.xlu1 %71  ;;  %465 = vmatprep.subr.mxu0 %v129_v44 }
  0x91   :  { %466 = vmatpush3.msra.mxu0 %v129_v44  ;;  %v90_v54 = vmul.f32 %v89_v34, %v72_v49  ;;  %v127_v1 = vmax.f32 %v123_v58, 0.0 }
  0x92   :  { %v152_v51 = vpop.permute.xlu0 %151 }
  0x93   :  { %v163_v61 = vmul.f32 %v440_v56, %v152_v51  ;;  %v94_v63 = vadd.f32 %v90_v54, %v66_v52 }
  0x95   :  { %v115_v57 = vpop.permute.xlu1 %114 }
  0x96   :  { %v124_v59 = vadd.f32 %v115_v57, %v96_v55  ;;  %v186_v60 = vpop.permute.xlu0 %185 }
  0x97   :  { %v191_v2 = vadd.f32 %v186_v60, %v163_v61 }
  0x98   :  { %v128_v62 = vmax.f32 %v124_v59, 0.0 }
  0x99   :  { %v105_v0 = vpop.permute.xlu1 %104  ;;  %v195_v7 = vmax.f32 %v191_v2, 0.0 }
  0x9a   :  { %v122_v3 = vadd.f32 %v105_v0, %v94_v63  ;;  %467 = vmatprep.subr.mxu0 %v128_v62  ;;  %v181_v5 = vpop.permute.xlu0 %180 }
  0x9b   :  { %468 = vmatpush3.msra.mxu0 %v128_v62 }
  0x9c   :  { %v126_v4 = vmax.f32 %v122_v3, 0.0  ;;  %469 = vmatprep.subr.mxu0 %v127_v1 }
  0x9d   :  { %v147_v6 = vpop.permute.xlu1 %146  ;;  %470 = vmatpush3.msra.mxu0 %v127_v1 }
  0x9e   :  { %v162_v8 = vmul.f32 %v440_v56, %v147_v6  ;;  %471 = vmatprep.subr.mxu0 %v126_v4  ;;  %v176_v13 = vpop.permute.xlu0 %175 }
  0x9f   :  { %472 = vmatpush3.msra.mxu0 %v126_v4 }
  0xa0   :  { %v190_v9 = vadd.f32 %v181_v5, %v162_v8  ;;  %473 = vmatprep.subr.mxu0 %v195_v7 }
  0xa1   :  { %v142_v10 = vpop.permute.xlu1 %141  ;;  %474 = vmatpush3.msra.mxu0 %v195_v7 }
  0xa2   :  { %v194_v11 = vmax.f32 %v190_v9, 0.0  ;;  %v161_v12 = vmul.f32 %v440_v56, %v142_v10  ;;  %v222_v25 = vpop.permute.xlu0 %221 }
  0xa4   :  { %v189_v14 = vadd.f32 %v176_v13, %v161_v12  ;;  %475 = vmatprep.subr.mxu0 %v194_v11 }
  0xa5   :  { %v137_v15 = vpop.permute.xlu1 %136  ;;  %476 = vmatpush3.msra.mxu0 %v194_v11 }
  0xa6   :  { %v193_v16 = vmax.f32 %v189_v14, 0.0  ;;  %v160_v17 = vmul.f32 %v440_v56, %v137_v15  ;;  %v212_v31 = vpop.permute.xlu0 %211 }
  0xa8   :  { %477 = vmatprep.subr.mxu0 %v193_v16 }
  0xa9   :  { %v171_v18 = vpop.permute.xlu1 %170  ;;  %478 = vmatpush3.msra.mxu0 %v193_v16 }
  0xaa   :  { %v188_v19 = vadd.f32 %v171_v18, %v160_v17  ;;  %v333_v45 = vpop.permute.xlu0 %332 }
  0xac   :  { %v192_v20 = vmax.f32 %v188_v19, 0.0 }
  0xad   :  { %v217_v27 = vpop.permute.xlu1 %216 }
  0xae   :  { %479 = vmatprep.subr.mxu0 %v192_v20 }
  0xaf   :  { %480 = vmatpush3.msra.mxu0 %v192_v20 }
  0xb0   :  { %482 = vmatmul.mubr.msk.f32.vlgmr.msra.gmra.mxu0 %vm224_vm0, %v197_v21 }
  0xb1   :  { %484 = vmatprep.mubr.msk.f32.mxu0 %vm224_vm0, %v198_v22  ;;  %v207_v36 = vpop.permute.xlu1 %206 }
  0xb4   :  { %485 = vmatmul.mubr.msk.f32.gmra.mxu0 %vm224_vm0, %v199_v23 }
  0xb5   :  { %v338_v42 = vpop.permute.xlu1 %337 }
 0x170   :  { %v483_v26 = vpop.f32.mrf.mxu0 }
 0x171   :  { %v309_v33 = vadd.f32 %v483_v26, %v212_v31 }
 0x172   :  { %v303_v28 = vpop.f32.mrf.mxu0 }
 0x173   :  { %v304_v37 = vadd.f32 %v303_v28, %v207_v36  ;;  %v323_v39 = vmax.f32 %v309_v33, 0.0 }
 0x174   :  { %v486_v29 = vpop.f32.mrf.mxu0 }
 0x175   :  { %v319_v30 = vadd.f32 %v486_v29, %v222_v25  ;;  %v322_v40 = vmax.f32 %v304_v37, 0.0 }
 0x176   :  { %v313_v32 = vpop.f32.mrf.mxu0 }
 0x177   :  { %v325_v34 = vmax.f32 %v319_v30, 0.0  ;;  %v314_v35 = vadd.f32 %v313_v32, %v217_v27 }
 0x179   :  { %v324_v38 = vmax.f32 %v314_v35, 0.0  ;;  %487 = vmatprep.subr.mxu1 %v325_v34 }
 0x17a   :  { %488 = vmatpush3.msra.mxu1 %v325_v34 }
 0x17b   :  { %489 = vmatprep.subr.mxu1 %v324_v38 }
 0x17c   :  { %490 = vmatpush3.msra.mxu1 %v324_v38 }
 0x17d   :  { %491 = vmatprep.subr.mxu1 %v323_v39 }
 0x17e   :  { %492 = vmatpush3.msra.mxu1 %v323_v39 }
 0x17f   :  { %493 = vmatprep.subr.mxu1 %v322_v40 }
 0x180   :  { %494 = vmatpush3.msra.mxu1 %v322_v40 }
 0x181   :  { %496 = vmatmul.mubr.msk.f32.vlgmr.msra.gmra.mxu1 %vm340_vm1, %v327_v41 }
 0x241   :  { %v497_v43 = vpop.f32.mrf.mxu1 }
 0x242   :  { %v419_v44 = vadd.f32 %v497_v43, %v338_v42 }
 0x243   :  { %v413_v46 = vpop.f32.mrf.mxu1 }
 0x244   :  { %423 = vst [vmem:[#allocation2 + $0x8] sm:$0xff] %v419_v44  ;;  %v414_v47 = vadd.f32 %v413_v46, %v333_v45 }
 0x246   :  { %422 = vst [vmem:[#allocation2] sm:$0xff] %v414_v47 }
 0x247   :  { %521 = shalt.err (!%p518_p4)
}
 0x248   :  { %s535_s8 = smov 128   ;;  %s536_s25 = smov 8  }
 0x249   :  { %435 = dma.vmem_to_hbm [thread:$0]  %s430_s23, 256, %s701_s10, [#allocation3], %s535_s8, %s535_s8, %s536_s25  }
 0x24a   :  { %530 = dma.done.wait [#allocation3], 256  }
 0x24b   :  { %531 = vsyncadd [#allocation3], 4294967040 }
 0x24c   :  { %439 = vsyncpa [#allocation3], 1 }

</bundles_post_ra>
